<compile_context>
chip_gen: v7x
topology: tpu7x:2x2x1
jax: 0.10.0
libtpu: 0.0.40
codegen_flags: <defaults>
</compile_context>

<pallas_src>
import functools

import jax
import jax.numpy as jnp
from jax import lax
from jax.experimental import pallas as pl
from jax.experimental.pallas import tpu as pltpu


def convblock_kernel(xlhs_ref, comb_ref, labb_ref, binw_ref, p0s_ref, p0b_ref,
                     pa_ref, o_ref, sp_ref, *, num_images, height):
    # xlhs_ref: (N*H, 3*WC) f32  K-stacked folded input slabs [dh=0|dh=1|dh=2]
    # comb_ref: (3*WC, 2*WC) f32 K-stacked RHS: cols [0:WC]   = LAB delta conv
    #                                           cols [WC:2WC] = path1 + path2
    # labb_ref: (1, WC)   f32    LAB bias delta (tiled across W)
    # binw_ref: (3*WC, WC) bf16  binary-conv sign weights, K-stacked
    # p0s_ref : (1, WC)   f32    scale_var * alpha             (tiled)
    # p0b_ref : (1, WC)   f32    scale_var * bias + scale_mean (tiled)
    # pa_ref  : (1, WC)   f32    PReLU slope (tiled)
    # o_ref   : (N*H, WC) f32    output (lane-dense, full-width stores)
    # sp_ref  : (N*(H+2), WC) f32  scratch: per-image H-padded +-1 activations
    N, H = num_images, height
    WC = o_ref.shape[-1]

    xlhs = xlhs_ref[...]                                     # (N*H, 3*WC)

    # ---- fused MXU dot #1: LAB delta depthwise conv + (path1 + path2) ----
    lp = jnp.dot(xlhs, comb_ref[...], preferred_element_type=jnp.float32)
    lab = lp[:, :WC] + labb_ref[...]
    path12 = lp[:, WC:]

    # LAB forward value: argmax*2-1 (tie -> -1); kept f32 so the binarization
    # decision is bit-faithful.
    sign = jnp.where(lab > 0.0, 1.0, -1.0)

    # ---- H-pad the +-1 rows per image in scratch; zero ONLY the pad rows ----
    zrow = jnp.zeros((1, WC), jnp.float32)
    for n in range(N):
        b = n * (H + 2)
        sp_ref[b:b + 1, :] = zrow
        sp_ref[b + 1:b + 1 + H, :] = sign[n * H:(n + 1) * H, :]
        sp_ref[b + H + 1:b + H + 2, :] = zrow

    # ---- K-stacked sign LHS; one cast to bf16 (+-1 is exact in bf16) ----
    slabs = []
    for dh in range(3):
        parts = [sp_ref[n * (H + 2) + dh: n * (H + 2) + dh + H, :]
                 for n in range(N)]
        slabs.append(parts[0] if N == 1 else jnp.concatenate(parts, axis=0))
    sign_lhs = jnp.concatenate(slabs, axis=1).astype(jnp.bfloat16)  # (N*H,3WC)

    # ---- fused MXU dot #2: BinaryConv2d ({-1,0,+1} x {-1,0,+1}, f32 acc);
    #      alpha + Scale folded into a per-lane scale/bias epilogue ----
    acc0 = jnp.dot(sign_lhs, binw_ref[...], preferred_element_type=jnp.float32)
    path0 = acc0 * p0s_ref[...] + p0b_ref[...]

    # ---- PReLU + residual; residual x is the center (dh=1) slab of xlhs ----
    x = xlhs[:, WC:2 * WC]
    s = path0 + path12
    act = jnp.where(s >= 0.0, s, pa_ref[...] * s)
    o_ref[...] = act + x


def _banded_conv_weights(taps, W):
    """Banded weight matrices for a stride-1 pad-1 3x3 conv on the folded
    (W*C) lane axis.

    taps: (3, 3, Cin, Cout) f32, indexed [dh, dw, cin, cout].
    Returns (3, W*Cin, W*Cout) with
        M[dh, wi*Cin + ci, wo*Cout + co] = taps[dh, wi - wo + 1, ci, co]
    when 0 <= wi - wo + 1 < 3 else 0, so that
        out[h, wo*Cout + co] = sum_dh (input_pad_row[h + dh] @ M[dh])[...]
    realizes the conv; W-direction zero padding is encoded in the band
    structure, H-direction padding by two zero rows on the input.
    """
    _, _, Cin, Cout = taps.shape
    wi = jnp.arange(W)[:, None]
    wo = jnp.arange(W)[None, :]
    dw = wi - wo + 1                                       # (W, W)
    valid = (dw >= 0) & (dw < 3)
    blocks = taps[:, jnp.clip(dw, 0, 2)]                   # (3, W, W, Cin, Cout)
    blocks = jnp.where(valid[None, :, :, None, None], blocks, 0.0)
    blocks = jnp.transpose(blocks, (0, 1, 3, 2, 4))        # (3, W, Cin, W, Cout)
    return blocks.reshape(3, W * Cin, W * Cout)


def conv_block_forward(x_nchw, params, group_size):
    (lab_w, lab_b, bconv_w, bconv_b, scale_mean, scale_var,
     prelu_a, dw_w, w1x1) = params
    N, C, H, W = x_nchw.shape
    WC = W * C
    f32 = jnp.float32

    # NCHW -> folded lane-dense (N, H, W*C), pad H only (W padding lives in the
    # banded weights), then K-stack the three dh slabs and stack the batch on M.
    # NOTE: for an end-to-end network, keep this folded layout across layers so
    # these wrapper-side reshuffles amortize away.
    x_f = jnp.transpose(x_nchw, (0, 2, 3, 1)).astype(f32).reshape(N, H, WC)
    xp = jnp.pad(x_f, ((0, 0), (1, 1), (0, 0)))
    xlhs = jnp.concatenate([xp[:, dh:dh + H, :] for dh in range(3)],
                           axis=-1).reshape(N * H, 3 * WC)

    def tile_c(v):                        # per-channel (C,) -> (1, W*C) tiled
        return jnp.tile(v.astype(f32), W).reshape(1, WC)

    eye_c = jnp.eye(C, dtype=f32)

    # ---- LAB delta depthwise conv: (w1 - w0), diagonal in channels ----
    lw = lab_w.reshape(C, 2, 3, 3)                       # out ch 2c+j -> [c, j]
    lwd = jnp.transpose(lw[:, 1] - lw[:, 0], (1, 2, 0))  # (3, 3, C)
    taps_lab = lwd[:, :, None, :] * eye_c[None, None]    # (3, 3, C, C)
    lab_banded = _banded_conv_weights(taps_lab, W)       # (3, WC, WC)
    lb = lab_b.reshape(C, 2)
    lab_bias = tile_c(lb[:, 1] - lb[:, 0])

    # ---- Binary conv: +-1 weights only (alpha factored out -> exact bf16);
    #      alpha and Scale folded into one scale/bias epilogue ----
    alpha = jnp.mean(jnp.abs(bconv_w), axis=(1, 2, 3))            # (C,)
    taps_bin = jnp.transpose(jnp.sign(bconv_w), (2, 3, 1, 0))     # (3,3,Cin,Cout)
    bin_banded = _banded_conv_weights(taps_bin, W).reshape(3 * WC, WC)
    bin_banded = bin_banded.astype(jnp.bfloat16)
    p0_scale = tile_c(scale_var * alpha)
    p0_bias = tile_c(scale_var * bconv_b + scale_mean)

    # ---- fp 1x1 conv composed INTO the grouped 3x3 conv:
    #      path1 + path2 = x conv (W1∘G + delta_center * W1) ----
    w1d = jnp.kron(jnp.eye(W, dtype=f32), jnp.transpose(w1x1.reshape(C, C)))
    ci = jnp.arange(C)[:, None]
    oc = jnp.arange(C)[None, :]
    same_group = (ci // group_size) == (oc // group_size)
    l_idx = jnp.clip(ci - (oc // group_size) * group_size, 0, group_size - 1)
    dwt = jnp.transpose(dw_w, (2, 3, 1, 0))                       # (3,3,gs,C)
    taps_grp = jnp.where(same_group[None, None],
                         dwt[:, :, l_idx, jnp.broadcast_to(oc, (C, C))], 0.0)
    grp_banded = _banded_conv_weights(taps_grp, W)                # (3, WC, WC)
    p12_banded = jnp.einsum('ij,djk->dik', w1d, grp_banded,
                            precision=lax.Precision.HIGHEST)
    p12_banded = p12_banded.at[1].add(w1d)                        # + path1

    # one combined RHS: cols [0:WC]=LAB, [WC:2WC]=path1+path2  (K-stacked)
    comb = jnp.concatenate([lab_banded, p12_banded],
                           axis=-1).reshape(3 * WC, 2 * WC)

    prelu_t = tile_c(prelu_a)

    kernel = functools.partial(convblock_kernel, num_images=N, height=H)
    out = pl.pallas_call(
        kernel,
        out_shape=jax.ShapeDtypeStruct((N * H, WC), f32),
        grid_spec=pltpu.PrefetchScalarGridSpec(
            num_scalar_prefetch=0,
            grid=(1,),                     # single step: batch is stacked on M
            in_specs=[
                pl.BlockSpec((N * H, 3 * WC), lambda i: (0, 0)),   # x LHS
                pl.BlockSpec((3 * WC, 2 * WC), lambda i: (0, 0)),  # LAB|p12 RHS
                pl.BlockSpec((1, WC), lambda i: (0, 0)),           # LAB bias
                pl.BlockSpec((3 * WC, WC), lambda i: (0, 0)),      # bin conv w
                pl.BlockSpec((1, WC), lambda i: (0, 0)),           # p0 scale
                pl.BlockSpec((1, WC), lambda i: (0, 0)),           # p0 bias
                pl.BlockSpec((1, WC), lambda i: (0, 0)),           # prelu
            ],
            out_specs=pl.BlockSpec((N * H, WC), lambda i: (0, 0)),
            scratch_shapes=[pltpu.VMEM((N * (H + 2), WC), f32)],
        ),
        compiler_params=pltpu.CompilerParams(
            dimension_semantics=("arbitrary",)),
    )(xlhs, comb, lab_bias, bin_banded, p0_scale, p0_bias, prelu_t)

    # folded (N*H, W*C) -> NCHW
    return jnp.transpose(out.reshape(N, H, W, C), (0, 3, 1, 2))


def conv_block_reference(x, params, group_size):
    """Pure-JAX NCHW reference mirroring the PyTorch forward."""
    (lab_w, lab_b, bconv_w, bconv_b, scale_mean, scale_var,
     prelu_a, dw_w, w1x1) = params
    N, C, H, W = x.shape
    dn = ('NCHW', 'OIHW', 'NCHW')
    prec = lax.Precision.HIGHEST

    lab = lax.conv_general_dilated(x, lab_w, (1, 1), [(1, 1), (1, 1)],
                                   dimension_numbers=dn, feature_group_count=C,
                                   precision=prec)
    lab = lab + lab_b.reshape(1, 2 * C, 1, 1)
    lab = lab.reshape(N, C, 2, H, W)
    xb = jnp.where(lab[:, :, 1] > lab[:, :, 0], 1.0, -1.0)

    alpha = jnp.mean(jnp.abs(bconv_w), axis=(1, 2, 3))
    w_eff = jnp.sign(bconv_w) * alpha[:, None, None, None]
    y = lax.conv_general_dilated(xb, w_eff, (1, 1), [(1, 1), (1, 1)],
                                 dimension_numbers=dn, precision=prec)
    y = y + bconv_b.reshape(1, C, 1, 1)
    path0 = scale_var.reshape(1, C, 1, 1) * y + scale_mean.reshape(1, C, 1, 1)

    path1 = lax.conv_general_dilated(x, w1x1, (1, 1), [(0, 0), (0, 0)],
                                     dimension_numbers=dn, precision=prec)
    path2 = lax.conv_general_dilated(path1, dw_w, (1, 1), [(1, 1), (1, 1)],
                                     dimension_numbers=dn,
                                     feature_group_count=C // group_size,
                                     precision=prec)
    s = path0 + path1 + path2
    act = jnp.where(s >= 0.0, s, prelu_a.reshape(1, C, 1, 1) * s)
    return act + x


if __name__ == "__main__":
    N, C, H, W = 2, 8, 16, 16        # W * C = 128 -> lane-dense folded layout
    group_size = 2

    key = jax.random.PRNGKey(0)
    ks = jax.random.split(key, 9)
    lab_w = jax.random.normal(ks[0], (2 * C, 1, 3, 3), jnp.float32) * 0.5
    lab_b = jax.random.normal(ks[1], (2 * C,), jnp.float32) * 0.1
    bconv_w = jax.random.normal(ks[2], (C, C, 3, 3), jnp.float32) * 0.3
    bconv_b = jax.random.normal(ks[3], (C,), jnp.float32) * 0.1
    scale_mean = jax.random.normal(ks[4], (C,), jnp.float32) * 0.1      # torch init: zeros
    scale_var = 1.0 + jax.random.normal(ks[5], (C,), jnp.float32) * 0.1  # torch init: ones
    prelu_a = jnp.full((C,), 0.25, jnp.float32)                          # torch PReLU default
    dw_w = jax.random.normal(ks[6], (C, group_size, 3, 3), jnp.float32) * 0.3
    w1x1 = jax.random.normal(ks[7], (C, C, 1, 1), jnp.float32) * 0.3
    x = jax.random.normal(ks[8], (N, C, H, W), jnp.float32)

    params = (lab_w, lab_b, bconv_w, bconv_b, scale_mean, scale_var,
              prelu_a, dw_w, w1x1)

    out = conv_block_forward(x, params, group_size)
    out = jax.block_until_ready(out)

    ref = conv_block_reference(x, params, group_size)
    assert out.shape == ref.shape == (N, C, H, W)
    # tolerate rare LAB argmax near-ties flipping sign between implementations
    match = float(jnp.mean((jnp.abs(out - ref) < 1e-3).astype(jnp.float32)))
    assert match > 0.98, f"only {match:.4f} of elements match reference"
    print("KERNEL_OK")
</pallas_src>

<mosaic_0001>
module attributes {stable_mosaic.version = 11 : i64} {
  func.func @convblock_kernel(%arg0: i32, %arg1: memref<32x384xf32, #tpu.memory_space<vmem>>, %arg2: memref<384x256xf32, #tpu.memory_space<vmem>>, %arg3: memref<1x128xf32, #tpu.memory_space<vmem>>, %arg4: memref<384x128xbf16, #tpu.memory_space<vmem>>, %arg5: memref<1x128xf32, #tpu.memory_space<vmem>>, %arg6: memref<1x128xf32, #tpu.memory_space<vmem>>, %arg7: memref<1x128xf32, #tpu.memory_space<vmem>>, %arg8: memref<32x128xf32, #tpu.memory_space<vmem>>, %arg9: memref<36x128xf32, #tpu.memory_space<vmem>>) attributes {dimension_semantics = [#tpu.dimension_semantics<arbitrary>], iteration_bounds = array<i64: 1>, scalar_prefetch = 0 : i64, scratch_operands = 1 : i64, tpu.core_type = #tpu.core_type<tc>, window_params = [{pipeline_mode = #tpu.pipeline_mode<synchronous>, transform_indices = @transform_0, window_bounds = array<i64: 32, 384>}, {pipeline_mode = #tpu.pipeline_mode<synchronous>, transform_indices = @transform_1, window_bounds = array<i64: 384, 256>}, {pipeline_mode = #tpu.pipeline_mode<synchronous>, transform_indices = @transform_2, window_bounds = array<i64: 1, 128>}, {pipeline_mode = #tpu.pipeline_mode<synchronous>, transform_indices = @transform_3, window_bounds = array<i64: 384, 128>}, {pipeline_mode = #tpu.pipeline_mode<synchronous>, transform_indices = @transform_4, window_bounds = array<i64: 1, 128>}, {pipeline_mode = #tpu.pipeline_mode<synchronous>, transform_indices = @transform_5, window_bounds = array<i64: 1, 128>}, {pipeline_mode = #tpu.pipeline_mode<synchronous>, transform_indices = @transform_6, window_bounds = array<i64: 1, 128>}, {pipeline_mode = #tpu.pipeline_mode<synchronous>, transform_indices = @transform_7, window_bounds = array<i64: 32, 128>}]} {
    %c0 = arith.constant 0 : index
    %c0_0 = arith.constant 0 : index
    %0 = vector.load %arg1[%c0, %c0_0] : memref<32x384xf32, #tpu.memory_space<vmem>>, vector<32x384xf32>
    %c0_1 = arith.constant 0 : index
    %c0_2 = arith.constant 0 : index
    %1 = vector.load %arg2[%c0_1, %c0_2] : memref<384x256xf32, #tpu.memory_space<vmem>>, vector<384x256xf32>
    %cst = arith.constant dense<0.000000e+00> : vector<32x256xf32>
    %2 = tpu.matmul %0, %1, %cst {dimension_numbers = #tpu.dot_dimension_numbers<[1], [0], [0], [1], [0, 0, 1, 1], [], []>} : vector<32x384xf32>, vector<384x256xf32>, vector<32x256xf32> -> vector<32x256xf32>
    %3 = vector.extract_strided_slice %2 {offsets = [0, 0], sizes = [32, 128], strides = [1, 1]} : vector<32x256xf32> to vector<32x128xf32>
    %c0_3 = arith.constant 0 : index
    %c0_4 = arith.constant 0 : index
    %4 = vector.load %arg3[%c0_3, %c0_4] : memref<1x128xf32, #tpu.memory_space<vmem>>, vector<1x128xf32>
    %5 = vector.broadcast %4 : vector<1x128xf32> to vector<32x128xf32>
    %6 = arith.addf %3, %5 : vector<32x128xf32>
    %7 = vector.extract_strided_slice %2 {offsets = [0, 128], sizes = [32, 128], strides = [1, 1]} : vector<32x256xf32> to vector<32x128xf32>
    %cst_5 = arith.constant 0.000000e+00 : f32
    %8 = vector.broadcast %cst_5 : f32 to vector<32x128xf32>
    %9 = arith.cmpf ogt, %6, %8 : vector<32x128xf32>
    %cst_6 = arith.constant 1.000000e+00 : f32
    %cst_7 = arith.constant -1.000000e+00 : f32
    %10 = vector.broadcast %cst_6 : f32 to vector<32x128xf32>
    %11 = vector.broadcast %cst_7 : f32 to vector<32x128xf32>
    %12 = arith.select %9, %10, %11 : vector<32x128xi1>, vector<32x128xf32>
    %cst_8 = arith.constant 0.000000e+00 : f32
    %13 = vector.broadcast %cst_8 : f32 to vector<1x128xf32>
    %c0_9 = arith.constant 0 : index
    %c0_10 = arith.constant 0 : index
    %14 = vector.load %arg9[%c0_9, %c0_10] : memref<36x128xf32, #tpu.memory_space<vmem>>, vector<1x128xf32>
    tpu.vector_store %arg9[%c0_9, %c0_10], %13 {strides = array<i32>} : memref<36x128xf32, #tpu.memory_space<vmem>>, vector<1x128xf32>,
    %15 = vector.extract_strided_slice %12 {offsets = [0, 0], sizes = [16, 128], strides = [1, 1]} : vector<32x128xf32> to vector<16x128xf32>
    %c1 = arith.constant 1 : index
    %c0_11 = arith.constant 0 : index
    %16 = vector.load %arg9[%c1, %c0_11] : memref<36x128xf32, #tpu.memory_space<vmem>>, vector<16x128xf32>
    tpu.vector_store %arg9[%c1, %c0_11], %15 {strides = array<i32>} : memref<36x128xf32, #tpu.memory_space<vmem>>, vector<16x128xf32>,
    %c17 = arith.constant 17 : index
    %c0_12 = arith.constant 0 : index
    %17 = vector.load %arg9[%c17, %c0_12] : memref<36x128xf32, #tpu.memory_space<vmem>>, vector<1x128xf32>
    tpu.vector_store %arg9[%c17, %c0_12], %13 {strides = array<i32>} : memref<36x128xf32, #tpu.memory_space<vmem>>, vector<1x128xf32>,
    %c18 = arith.constant 18 : index
    %c0_13 = arith.constant 0 : index
    %18 = vector.load %arg9[%c18, %c0_13] : memref<36x128xf32, #tpu.memory_space<vmem>>, vector<1x128xf32>
    tpu.vector_store %arg9[%c18, %c0_13], %13 {strides = array<i32>} : memref<36x128xf32, #tpu.memory_space<vmem>>, vector<1x128xf32>,
    %19 = vector.extract_strided_slice %12 {offsets = [16, 0], sizes = [16, 128], strides = [1, 1]} : vector<32x128xf32> to vector<16x128xf32>
    %c19 = arith.constant 19 : index
    %c0_14 = arith.constant 0 : index
    %20 = vector.load %arg9[%c19, %c0_14] : memref<36x128xf32, #tpu.memory_space<vmem>>, vector<16x128xf32>
    tpu.vector_store %arg9[%c19, %c0_14], %19 {strides = array<i32>} : memref<36x128xf32, #tpu.memory_space<vmem>>, vector<16x128xf32>,
    %c35 = arith.constant 35 : index
    %c0_15 = arith.constant 0 : index
    %21 = vector.load %arg9[%c35, %c0_15] : memref<36x128xf32, #tpu.memory_space<vmem>>, vector<1x128xf32>
    tpu.vector_store %arg9[%c35, %c0_15], %13 {strides = array<i32>} : memref<36x128xf32, #tpu.memory_space<vmem>>, vector<1x128xf32>,
    %c0_16 = arith.constant 0 : index
    %c0_17 = arith.constant 0 : index
    %22 = vector.load %arg9[%c0_16, %c0_17] : memref<36x128xf32, #tpu.memory_space<vmem>>, vector<16x128xf32>
    %c18_18 = arith.constant 18 : index
    %c0_19 = arith.constant 0 : index
    %23 = vector.load %arg9[%c18_18, %c0_19] : memref<36x128xf32, #tpu.memory_space<vmem>>, vector<16x128xf32>
    %24 = tpu.concatenate %22, %23 in 0 : vector<16x128xf32>, vector<16x128xf32> -> vector<32x128xf32>
    %c1_20 = arith.constant 1 : index
    %c0_21 = arith.constant 0 : index
    %25 = vector.load %arg9[%c1_20, %c0_21] : memref<36x128xf32, #tpu.memory_space<vmem>>, vector<16x128xf32>
    %c19_22 = arith.constant 19 : index
    %c0_23 = arith.constant 0 : index
    %26 = vector.load %arg9[%c19_22, %c0_23] : memref<36x128xf32, #tpu.memory_space<vmem>>, vector<16x128xf32>
    %27 = tpu.concatenate %25, %26 in 0 : vector<16x128xf32>, vector<16x128xf32> -> vector<32x128xf32>
    %c2 = arith.constant 2 : index
    %c0_24 = arith.constant 0 : index
    %28 = vector.load %arg9[%c2, %c0_24] : memref<36x128xf32, #tpu.memory_space<vmem>>, vector<16x128xf32>
    %c20 = arith.constant 20 : index
    %c0_25 = arith.constant 0 : index
    %29 = vector.load %arg9[%c20, %c0_25] : memref<36x128xf32, #tpu.memory_space<vmem>>, vector<16x128xf32>
    %30 = tpu.concatenate %28, %29 in 0 : vector<16x128xf32>, vector<16x128xf32> -> vector<32x128xf32>
    %31 = tpu.concatenate %24, %27, %30 in 1 : vector<32x128xf32>, vector<32x128xf32>, vector<32x128xf32> -> vector<32x384xf32>
    %32 = arith.truncf %31 : vector<32x384xf32> to vector<32x384xbf16>
    %c0_26 = arith.constant 0 : index
    %c0_27 = arith.constant 0 : index
    %33 = vector.load %arg4[%c0_26, %c0_27] : memref<384x128xbf16, #tpu.memory_space<vmem>>, vector<384x128xbf16>
    %cst_28 = arith.constant dense<0.000000e+00> : vector<32x128xf32>
    %34 = tpu.matmul %32, %33, %cst_28 {dimension_numbers = #tpu.dot_dimension_numbers<[1], [0], [0], [1], [0, 0, 1, 1], [], []>} : vector<32x384xbf16>, vector<384x128xbf16>, vector<32x128xf32> -> vector<32x128xf32>
    %c0_29 = arith.constant 0 : index
    %c0_30 = arith.constant 0 : index
    %35 = vector.load %arg5[%c0_29, %c0_30] : memref<1x128xf32, #tpu.memory_space<vmem>>, vector<1x128xf32>
    %36 = vector.broadcast %35 : vector<1x128xf32> to vector<32x128xf32>
    %37 = arith.mulf %34, %36 : vector<32x128xf32>
    %c0_31 = arith.constant 0 : index
    %c0_32 = arith.constant 0 : index
    %38 = vector.load %arg6[%c0_31, %c0_32] : memref<1x128xf32, #tpu.memory_space<vmem>>, vector<1x128xf32>
    %39 = vector.broadcast %38 : vector<1x128xf32> to vector<32x128xf32>
    %40 = arith.addf %37, %39 : vector<32x128xf32>
    %41 = vector.extract_strided_slice %0 {offsets = [0, 128], sizes = [32, 128], strides = [1, 1]} : vector<32x384xf32> to vector<32x128xf32>
    %42 = arith.addf %40, %7 : vector<32x128xf32>
    %cst_33 = arith.constant 0.000000e+00 : f32
    %43 = vector.broadcast %cst_33 : f32 to vector<32x128xf32>
    %44 = arith.cmpf oge, %42, %43 : vector<32x128xf32>
    %c0_34 = arith.constant 0 : index
    %c0_35 = arith.constant 0 : index
    %45 = vector.load %arg7[%c0_34, %c0_35] : memref<1x128xf32, #tpu.memory_space<vmem>>, vector<1x128xf32>
    %46 = vector.broadcast %45 : vector<1x128xf32> to vector<32x128xf32>
    %47 = arith.mulf %46, %42 : vector<32x128xf32>
    %48 = arith.select %44, %42, %47 : vector<32x128xi1>, vector<32x128xf32>
    %49 = arith.addf %48, %41 : vector<32x128xf32>
    %c0_36 = arith.constant 0 : index
    %c0_37 = arith.constant 0 : index
    %50 = vector.load %arg8[%c0_36, %c0_37] : memref<32x128xf32, #tpu.memory_space<vmem>>, vector<32x128xf32>
    tpu.vector_store %arg8[%c0_36, %c0_37], %49 {strides = array<i32>} : memref<32x128xf32, #tpu.memory_space<vmem>>, vector<32x128xf32>,
    return
  }
  func.func @transform_0(%arg0: i32) -> (i32, i32) {
    %c0_i32 = arith.constant 0 : i32
    %c0_i32_0 = arith.constant 0 : i32
    %c0_i32_1 = arith.constant 0 : i32
    return %c0_i32, %c0_i32_0 : i32, i32
  }
  func.func @transform_1(%arg0: i32) -> (i32, i32) {
    %c0_i32 = arith.constant 0 : i32
    %c0_i32_0 = arith.constant 0 : i32
    %c0_i32_1 = arith.constant 0 : i32
    return %c0_i32, %c0_i32_0 : i32, i32
  }
  func.func @transform_2(%arg0: i32) -> (i32, i32) {
    %c0_i32 = arith.constant 0 : i32
    %c0_i32_0 = arith.constant 0 : i32
    %c0_i32_1 = arith.constant 0 : i32
    return %c0_i32, %c0_i32_0 : i32, i32
  }
  func.func @transform_3(%arg0: i32) -> (i32, i32) {
    %c0_i32 = arith.constant 0 : i32
    %c0_i32_0 = arith.constant 0 : i32
    %c0_i32_1 = arith.constant 0 : i32
    return %c0_i32, %c0_i32_0 : i32, i32
  }
  func.func @transform_4(%arg0: i32) -> (i32, i32) {
    %c0_i32 = arith.constant 0 : i32
    %c0_i32_0 = arith.constant 0 : i32
    %c0_i32_1 = arith.constant 0 : i32
    return %c0_i32, %c0_i32_0 : i32, i32
  }
  func.func @transform_5(%arg0: i32) -> (i32, i32) {
    %c0_i32 = arith.constant 0 : i32
    %c0_i32_0 = arith.constant 0 : i32
    %c0_i32_1 = arith.constant 0 : i32
    return %c0_i32, %c0_i32_0 : i32, i32
  }
  func.func @transform_6(%arg0: i32) -> (i32, i32) {
    %c0_i32 = arith.constant 0 : i32
    %c0_i32_0 = arith.constant 0 : i32
    %c0_i32_1 = arith.constant 0 : i32
    return %c0_i32, %c0_i32_0 : i32, i32
  }
  func.func @transform_7(%arg0: i32) -> (i32, i32) {
    %c0_i32 = arith.constant 0 : i32
    %c0_i32_0 = arith.constant 0 : i32
    %c0_i32_1 = arith.constant 0 : i32
    return %c0_i32, %c0_i32_0 : i32, i32
  }
}

</mosaic_0001>

<bundles_post_ra>
// kernel: tpu_custom_call.1
= control target key start
LH: loop header
LB: loop body
LE: loop exit
PB: predicated region body
PF: predicated region fallthrough
CT: control target
= control target key end

     0   :  { %12 = vsyncpa [#allocation4], 0  ;;  %s1233_s0 = inlined_call_operand.hbm [shape: f32[32,384], index: 0, kind: input, shape index: {}]   ;;  %s1234_s1 = inlined_call_operand.hbm [shape: f32[384,256], index: 1, kind: input, shape index: {}]   ;;  %s1235_s2 = inlined_call_operand.vmem [shape: f32[1,128], index: 2, kind: input, shape index: {}]   ;;  %s1236_s3 = inlined_call_operand.hbm [shape: bf16[384,128], index: 3, kind: input, shape index: {}]   ;;  %s1237_s4 = inlined_call_operand.vmem [shape: f32[1,128], index: 4, kind: input, shape index: {}]   ;;  %s1238_s5 = inlined_call_operand.vmem [shape: f32[1,128], index: 5, kind: input, shape index: {}]   ;;  %s1239_s6 = inlined_call_operand.vmem [shape: f32[1,128], index: 6, kind: input, shape index: {}]   ;;  %s1240_s7 = inlined_call_operand.hbm [shape: f32[32,128], index: 7, kind: output, shape index: {}]  }
   0x1   :  { %13 = vsyncpa [#allocation7], 0 }
   0x2   :  { %14 = vsyncpa [#allocation5], 0  ;;  %s1083_s24 = smov [#allocation6]   ;;  %s989_s28 = scalar_lea.hbm %s1234_s1, 12288 }
   0x3   :  { %s32_s25 = sshll.u32 %s1083_s24, 4  ;;  %p990_p0 = scmp.ne.s32.totalorder %s1234_s1, %s989_s28  ;;  %s33_s25 = int_to_ptr.vmem [resolvable:$true] %s32_s25 }
   0x4   :  { %p993_p1 = scmp.lt.u32.totalorder %s989_s28, %s1234_s1 }
   0x6   :  { %p995_p2 = pnand %p993_p1, %p990_p0 }
   0x8   :  { %998 = shalt.err (!%p995_p2)
}
   0x9   :  { %s999_s10 = scalar_lea.vmem %s33_s25, 12288  ;;  %p1004_p4 = scmp.lt.s32.totalorder %s33_s25, %s33_s25 }
   0xa   :  { %p1000_p3 = scmp.ne.s32.totalorder %s33_s25, %s999_s10  ;;  %p1005_p5 = scmp.lt.s32.totalorder %s999_s10, %s999_s10 }
   0xc   :  { %p1006_p6 = por %p1005_p5, %p1004_p4 }
   0xe   :  { %p1007_p7 = pnand %p1006_p6, %p1000_p3 }
  0x10   :  { %1010 = shalt.err (!%p1007_p7)
}
  0x11   :  { %s1084_s11 = smov 256   ;;  %s1085_s12 = smov 16  }
  0x12   :  { %38 = dma.hbm_to_vmem [thread:$0]  %s1234_s1, 12288, %s33_s25, [#allocation7], %s1084_s11, %s1084_s11, %s1085_s12  }
  0x13   :  { %s1086_s15 = smov [#allocation3]   ;;  %s1011_s19 = scalar_lea.hbm %s1233_s0, 1536 }
  0x14   :  { %s20_s16 = sshll.u32 %s1086_s15, 4  ;;  %p1012_p8 = scmp.ne.s32.totalorder %s1233_s0, %s1011_s19  ;;  %s21_s16 = int_to_ptr.vmem [resolvable:$true] %s20_s16 }
  0x15   :  { %p1015_p9 = scmp.lt.u32.totalorder %s1011_s19, %s1233_s0 }
  0x17   :  { %p1017_p10 = pnand %p1015_p9, %p1012_p8 }
  0x19   :  { %1020 = shalt.err (!%p1017_p10)
}
  0x1a   :  { %s1021_s24 = scalar_lea.vmem %s21_s16, 1536  ;;  %p1026_p12 = scmp.lt.s32.totalorder %s21_s16, %s21_s16 }
  0x1b   :  { %p1022_p11 = scmp.ne.s32.totalorder %s21_s16, %s1021_s24  ;;  %p1027_p13 = scmp.lt.s32.totalorder %s1021_s24, %s1021_s24 }
  0x1d   :  { %p1028_p0 = por %p1027_p13, %p1026_p12 }
  0x1f   :  { %p1029_p1 = pnand %p1028_p0, %p1022_p11 }
  0x21   :  { %1032 = shalt.err (!%p1029_p1)
}
  0x22   :  { %s1087_s1 = smov 384   ;;  %s1088_s25 = smov 24  }
  0x23   :  { %26 = dma.hbm_to_vmem [thread:$0]  %s1233_s0, 1536, %s21_s16, [#allocation4], %s1087_s1, %s1087_s1, %s1088_s25  }
  0x24   :  { %s1089_s28 = smov [#allocation8]   ;;  %s1033_s9 = scalar_lea.hbm %s1236_s3, 3072 }
  0x25   :  { %s46_s29 = sshll.u32 %s1089_s28, 4  ;;  %p1034_p2 = scmp.ne.s32.totalorder %s1236_s3, %s1033_s9  ;;  %s47_s29 = int_to_ptr.vmem [resolvable:$true] %s46_s29 }
  0x26   :  { %p1037_p3 = scmp.lt.u32.totalorder %s1033_s9, %s1236_s3 }
  0x28   :  { %p1039_p4 = pnand %p1037_p3, %p1034_p2 }
  0x2a   :  { %1042 = shalt.err (!%p1039_p4)
}
  0x2b   :  { %s1043_s14 = scalar_lea.vmem %s47_s29, 3072  ;;  %p1048_p6 = scmp.lt.s32.totalorder %s47_s29, %s47_s29 }
  0x2c   :  { %p1044_p5 = scmp.ne.s32.totalorder %s47_s29, %s1043_s14  ;;  %p1049_p7 = scmp.lt.s32.totalorder %s1043_s14, %s1043_s14 }
  0x2e   :  { %p1050_p8 = por %p1049_p7, %p1048_p6 }
  0x30   :  { %p1051_p9 = pnand %p1050_p8, %p1044_p5 }
  0x32   :  { %1054 = shalt.err (!%p1051_p9)
}
  0x33   :  { %s1090_s0 = smov 64   ;;  %s1091_s15 = smov 4  }
  0x34   :  { %52 = dma.hbm_to_vmem [thread:$0]  %s1236_s3, 3072, %s47_s29, [#allocation7], %s1090_s0, %s1090_s0, %s1091_s15  }
  0x35   :  { %1077 = dma.done.wait [#allocation4], 1536  }
  0x36   :  { %1078 = vsyncadd [#allocation4], 4294965760 }
  0x37   :  { %1079 = dma.done.wait [#allocation7], 15360  }
  0x38   :  { %1080 = vsyncadd [#allocation7], 4294951936  ;;  %v1092_v0 = vmov 0.0   ;;  %v82_v1 = vld [vmem:[#allocation6 + $0x8] sm:$0xff]  ;;  %v84_v2 = vld [vmem:[#allocation6 + $0x18] sm:$0xff] }
  0x39   :  { %330 = vmatprep.mubr.f32.mxu1 %v1092_v0  ;;  %374 = vst [vmem:[#allocation2] sm:$0x1] %v1092_v0  ;;  %377 = vst [vmem:[#allocation2 + $0x11] sm:$0x1] %v1092_v0  ;;  %v81_v3 = vld [vmem:[#allocation6] sm:$0xff]  ;;  %v847_v4 = vpack.c.bf16 %v84_v2, %v82_v1  ;;  %v83_v5 = vld [vmem:[#allocation6 + $0x10] sm:$0xff] }
  0x3a   :  { %378 = vst [vmem:[#allocation2 + $0x12] sm:$0x1] %v1092_v0  ;;  %381 = vst [vmem:[#allocation2 + $0x23] sm:$0x1] %v1092_v0  ;;  %v86_v6 = vld [vmem:[#allocation6 + $0x28] sm:$0xff]  ;;  %v88_v7 = vld [vmem:[#allocation6 + $0x38] sm:$0xff]  ;;  %v849_v8 = vpack.c.bf16 %v83_v5, %v81_v3 }
  0x3b   :  { %v851_v9 = vpack.c.bf16 %v88_v7, %v86_v6  ;;  %v85_v10 = vld [vmem:[#allocation6 + $0x20] sm:$0xff]  ;;  %v87_v11 = vld [vmem:[#allocation6 + $0x30] sm:$0xff]  ;;  %v90_v12 = vld [vmem:[#allocation6 + $0x48] sm:$0xff]  ;;  %848 = vmatprep.subr.bf16.mxu0 %v847_v4 }
  0x3c   :  { %v92_v13 = vld [vmem:[#allocation6 + $0x58] sm:$0xff]  ;;  %850 = vmatpush1.bf16.msra.mxu0 %v849_v8  ;;  %v853_v14 = vpack.c.bf16 %v87_v11, %v85_v10  ;;  %v89_v16 = vld [vmem:[#allocation6 + $0x40] sm:$0xff]  ;;  %v91_v17 = vld [vmem:[#allocation6 + $0x50] sm:$0xff] }
  0x3d   :  { %852 = vmatprep.subr.bf16.mxu0 %v851_v9  ;;  %v855_v15 = vpack.c.bf16 %v92_v13, %v90_v12  ;;  %v94_v18 = vld [vmem:[#allocation6 + $0x68] sm:$0xff]  ;;  %v96_v19 = vld [vmem:[#allocation6 + $0x78] sm:$0xff]  ;;  %v857_v20 = vpack.c.bf16 %v91_v17, %v89_v16  ;;  %v93_v22 = vld [vmem:[#allocation6 + $0x60] sm:$0xff] }
  0x3e   :  { %v859_v21 = vpack.c.bf16 %v96_v19, %v94_v18  ;;  %v95_v23 = vld [vmem:[#allocation6 + $0x70] sm:$0xff]  ;;  %v98_v24 = vld [vmem:[#allocation6 + $0x88] sm:$0xff]  ;;  %v100_v25 = vld [vmem:[#allocation6 + $0x98] sm:$0xff] }
  0x3f   :  { %v146_v26 = vld [vmem:[#allocation6 + $0x208] sm:$0xff]  ;;  %v148_v27 = vld [vmem:[#allocation6 + $0x218] sm:$0xff]  ;;  %v861_v28 = vpack.c.bf16 %v95_v23, %v93_v22  ;;  %v97_v29 = vld [vmem:[#allocation6 + $0x80] sm:$0xff]  ;;  %v863_v33 = vpack.c.bf16 %v100_v25, %v98_v24 }
  0x40   :  { %854 = vmatpush1.bf16.msra.mxu0 %v853_v14  ;;  %v911_v30 = vpack.c.bf16 %v148_v27, %v146_v26  ;;  %v145_v31 = vld [vmem:[#allocation6 + $0x200] sm:$0xff]  ;;  %v147_v32 = vld [vmem:[#allocation6 + $0x210] sm:$0xff]  ;;  %v150_v36 = vld [vmem:[#allocation6 + $0x228] sm:$0xff] }
  0x41   :  { %856 = vmatprep.subr.bf16.mxu0 %v855_v15  ;;  %v99_v34 = vld [vmem:[#allocation6 + $0x90] sm:$0xff]  ;;  %v913_v35 = vpack.c.bf16 %v147_v32, %v145_v31  ;;  %v152_v37 = vld [vmem:[#allocation6 + $0x238] sm:$0xff]  ;;  %v102_v38 = vld [vmem:[#allocation6 + $0xa8] sm:$0xff] }
  0x42   :  { %v104_v39 = vld [vmem:[#allocation6 + $0xb8] sm:$0xff]  ;;  %912 = vmatprep.subr.bf16.mxu1 %v911_v30  ;;  %v915_v40 = vpack.c.bf16 %v152_v37, %v150_v36  ;;  %v149_v41 = vld [vmem:[#allocation6 + $0x220] sm:$0xff]  ;;  %v151_v42 = vld [vmem:[#allocation6 + $0x230] sm:$0xff]  ;;  %v865_v43 = vpack.c.bf16 %v99_v34, %v97_v29 }
  0x43   :  { %914 = vmatpush1.bf16.msra.mxu1 %v913_v35  ;;  %v101_v44 = vld [vmem:[#allocation6 + $0xa0] sm:$0xff]  ;;  %v917_v45 = vpack.c.bf16 %v151_v42, %v149_v41  ;;  %v154_v46 = vld [vmem:[#allocation6 + $0x248] sm:$0xff]  ;;  %v156_v47 = vld [vmem:[#allocation6 + $0x258] sm:$0xff]  ;;  %v867_v48 = vpack.c.bf16 %v104_v39, %v102_v38 }
  0x44   :  { %858 = vmatpush1.bf16.msra.mxu0 %v857_v20  ;;  %916 = vmatprep.subr.bf16.mxu1 %v915_v40  ;;  %v103_v49 = vld [vmem:[#allocation6 + $0xb0] sm:$0xff]  ;;  %v919_v50 = vpack.c.bf16 %v156_v47, %v154_v46  ;;  %v153_v51 = vld [vmem:[#allocation6 + $0x240] sm:$0xff]  ;;  %v106_v53 = vld [vmem:[#allocation6 + $0xc8] sm:$0xff] }
  0x45   :  { %860 = vmatprep.subr.bf16.mxu0 %v859_v21  ;;  %v155_v52 = vld [vmem:[#allocation6 + $0x250] sm:$0xff]  ;;  %v108_v54 = vld [vmem:[#allocation6 + $0xd8] sm:$0xff]  ;;  %v158_v55 = vld [vmem:[#allocation6 + $0x268] sm:$0xff]  ;;  %v869_v58 = vpack.c.bf16 %v103_v49, %v101_v44 }
  0x46   :  { %v921_v56 = vpack.c.bf16 %v155_v52, %v153_v51  ;;  %v160_v57 = vld [vmem:[#allocation6 + $0x278] sm:$0xff]  ;;  %v105_v59 = vld [vmem:[#allocation6 + $0xc0] sm:$0xff]  ;;  %v159_v62 = vld [vmem:[#allocation6 + $0x270] sm:$0xff]  ;;  %v871_v63 = vpack.c.bf16 %v108_v54, %v106_v53 }
  0x47   :  { %918 = vmatpush1.bf16.msra.mxu1 %v917_v45  ;;  %v923_v60 = vpack.c.bf16 %v160_v57, %v158_v55  ;;  %v157_v61 = vld [vmem:[#allocation6 + $0x260] sm:$0xff]  ;;  %v107_v1 = vld [vmem:[#allocation6 + $0xd0] sm:$0xff]  ;;  %v162_v2 = vld [vmem:[#allocation6 + $0x288] sm:$0xff] }
  0x48   :  { %862 = vmatpush1.bf16.msra.mxu0 %v861_v28  ;;  %920 = vmatprep.subr.bf16.mxu1 %v919_v50  ;;  %v164_v3 = vld [vmem:[#allocation6 + $0x298] sm:$0xff]  ;;  %v110_v4 = vld [vmem:[#allocation6 + $0xe8] sm:$0xff]  ;;  %v925_v6 = vpack.c.bf16 %v159_v62, %v157_v61  ;;  %v873_v7 = vpack.c.bf16 %v107_v1, %v105_v59  ;;  %v109_v8 = vld [vmem:[#allocation6 + $0xe0] sm:$0xff] }
  0x49   :  { %864 = vmatprep.subr.bf16.mxu0 %v863_v33  ;;  %v112_v5 = vld [vmem:[#allocation6 + $0xf8] sm:$0xff]  ;;  %v927_v9 = vpack.c.bf16 %v164_v3, %v162_v2  ;;  %v161_v10 = vld [vmem:[#allocation6 + $0x280] sm:$0xff]  ;;  %v163_v11 = vld [vmem:[#allocation6 + $0x290] sm:$0xff] }
  0x4a   :  { %v875_v12 = vpack.c.bf16 %v112_v5, %v110_v4  ;;  %v111_v13 = vld [vmem:[#allocation6 + $0xf0] sm:$0xff]  ;;  %v166_v14 = vld [vmem:[#allocation6 + $0x2a8] sm:$0xff]  ;;  %v168_v15 = vld [vmem:[#allocation6 + $0x2b8] sm:$0xff]  ;;  %v929_v18 = vpack.c.bf16 %v163_v11, %v161_v10 }
  0x4b   :  { %922 = vmatpush1.bf16.msra.mxu1 %v921_v56  ;;  %v114_v16 = vld [vmem:[#allocation6 + $0x108] sm:$0xff]  ;;  %v116_v17 = vld [vmem:[#allocation6 + $0x118] sm:$0xff]  ;;  %v877_v19 = vpack.c.bf16 %v111_v13, %v109_v8  ;;  %v113_v20 = vld [vmem:[#allocation6 + $0x100] sm:$0xff]  ;;  %v931_v21 = vpack.c.bf16 %v168_v15, %v166_v14 }
  0x4c   :  { %866 = vmatpush1.bf16.msra.mxu0 %v865_v43  ;;  %924 = vmatprep.subr.bf16.mxu1 %v923_v60  ;;  %v165_v22 = vld [vmem:[#allocation6 + $0x2a0] sm:$0xff]  ;;  %v167_v23 = vld [vmem:[#allocation6 + $0x2b0] sm:$0xff]  ;;  %v879_v24 = vpack.c.bf16 %v116_v17, %v114_v16  ;;  %v170_v26 = vld [vmem:[#allocation6 + $0x2c8] sm:$0xff] }
  0x4d   :  { %868 = vmatprep.subr.bf16.mxu0 %v867_v48  ;;  %v115_v25 = vld [vmem:[#allocation6 + $0x110] sm:$0xff]  ;;  %v172_v27 = vld [vmem:[#allocation6 + $0x2d8] sm:$0xff]  ;;  %v118_v28 = vld [vmem:[#allocation6 + $0x128] sm:$0xff]  ;;  %v933_v31 = vpack.c.bf16 %v167_v23, %v165_v22 }
  0x4e   :  { %v120_v29 = vld [vmem:[#allocation6 + $0x138] sm:$0xff]  ;;  %v117_v30 = vld [vmem:[#allocation6 + $0x120] sm:$0xff]  ;;  %v881_v32 = vpack.c.bf16 %v115_v25, %v113_v20  ;;  %v935_v33 = vpack.c.bf16 %v172_v27, %v170_v26  ;;  %v171_v35 = vld [vmem:[#allocation6 + $0x2d0] sm:$0xff] }
  0x4f   :  { %926 = vmatpush1.bf16.msra.mxu1 %v925_v6  ;;  %v169_v34 = vld [vmem:[#allocation6 + $0x2c0] sm:$0xff]  ;;  %v1178_v36 = vld [vmem:[#allocation3 + $0x8] sm:$0xff]  ;;  %v883_v37 = vpack.c.bf16 %v120_v29, %v118_v28  ;;  %v119_v38 = vld [vmem:[#allocation6 + $0x130] sm:$0xff] }
  0x50   :  { %870 = vmatpush1.bf16.msra.mxu0 %v869_v58  ;;  %928 = vmatprep.subr.bf16.mxu1 %v927_v9  ;;  %v174_v39 = vld [vmem:[#allocation6 + $0x2e8] sm:$0xff]  ;;  %v176_v40 = vld [vmem:[#allocation6 + $0x2f8] sm:$0xff]  ;;  %v121_v43 = vld [vmem:[#allocation6 + $0x140] sm:$0xff]  ;;  %v937_v45 = vpack.c.bf16 %v171_v35, %v169_v34  ;;  %v885_v47 = vpack.c.bf16 %v119_v38, %v117_v30 }
  0x51   :  { %872 = vmatprep.subr.bf16.mxu0 %v871_v63  ;;  %241 = vmatprep.mubr.f32.mxu0 %v1178_v36  ;;  %v122_v41 = vld [vmem:[#allocation6 + $0x148] sm:$0xff]  ;;  %v124_v42 = vld [vmem:[#allocation6 + $0x158] sm:$0xff]  ;;  %v123_v44 = vld [vmem:[#allocation6 + $0x150] sm:$0xff]  ;;  %v939_v48 = vpack.c.bf16 %v176_v40, %v174_v39 }
  0x52   :  { %v173_v46 = vld [vmem:[#allocation6 + $0x2e0] sm:$0xff]  ;;  %v175_v49 = vld [vmem:[#allocation6 + $0x2f0] sm:$0xff]  ;;  %v887_v50 = vpack.c.bf16 %v124_v42, %v122_v41  ;;  %v126_v51 = vld [vmem:[#allocation6 + $0x168] sm:$0xff]  ;;  %v889_v56 = vpack.c.bf16 %v123_v44, %v121_v43 }
  0x53   :  { %930 = vmatpush1.bf16.msra.mxu1 %v929_v18  ;;  %v128_v52 = vld [vmem:[#allocation6 + $0x178] sm:$0xff]  ;;  %v125_v53 = vld [vmem:[#allocation6 + $0x160] sm:$0xff]  ;;  %v127_v54 = vld [vmem:[#allocation6 + $0x170] sm:$0xff]  ;;  %v941_v55 = vpack.c.bf16 %v175_v49, %v173_v46 }
  0x54   :  { %874 = vmatpush1.bf16.msra.mxu0 %v873_v7  ;;  %932 = vmatprep.subr.bf16.mxu1 %v931_v21  ;;  %v130_v57 = vld [vmem:[#allocation6 + $0x188] sm:$0xff]  ;;  %v132_v58 = vld [vmem:[#allocation6 + $0x198] sm:$0xff]  ;;  %v965_v59 = vld [vmem:[#allocation8 + $0x40] sm:$0xff]   ;;  %v891_v60 = vpack.c.bf16 %v128_v52, %v126_v51  ;;  %v893_v3 = vpack.c.bf16 %v127_v54, %v125_v53 }
  0x55   :  { %876 = vmatprep.subr.bf16.mxu0 %v875_v12  ;;  %v71_v61 = vld [vmem:[#allocation3 + $0x10] sm:$0xff]  ;;  %v966_v62 = vld [vmem:[#allocation8] sm:$0xff]   ;;  %v967_v63 = vld [vmem:[#allocation8 + $0x48] sm:$0xff]   ;;  %v895_v6 = vpack.c.bf16 %v132_v58, %v130_v57 }
  0x56   :  { %v129_v1 = vld [vmem:[#allocation6 + $0x180] sm:$0xff]  ;;  %v131_v2 = vld [vmem:[#allocation6 + $0x190] sm:$0xff]  ;;  %v134_v4 = vld [vmem:[#allocation6 + $0x1a8] sm:$0xff] }
  0x57   :  { %934 = vmatpush1.bf16.msra.mxu1 %v933_v31  ;;  %v136_v5 = vld [vmem:[#allocation6 + $0x1b8] sm:$0xff]  ;;  %v74_v7 = vld [vmem:[#allocation3 + $0x28] sm:$0xff]  ;;  %v969_v9 = vld [vmem:[#allocation8 + $0x50] sm:$0xff]   ;;  %v897_v12 = vpack.c.bf16 %v131_v2, %v129_v1  ;;  %v1093_v2 = vmov -1.0  }
  0x58   :  { %878 = vmatpush1.bf16.msra.mxu0 %v877_v19  ;;  %936 = vmatprep.subr.bf16.mxu1 %v935_v33  ;;  %v968_v8 = vld [vmem:[#allocation8 + $0x8] sm:$0xff]   ;;  %v133_v10 = vld [vmem:[#allocation6 + $0x1a0] sm:$0xff]  ;;  %v135_v11 = vld [vmem:[#allocation6 + $0x1b0] sm:$0xff]  ;;  %v899_v15 = vpack.c.bf16 %v136_v5, %v134_v4 }
  0x59   :  { %880 = vmatprep.subr.bf16.mxu0 %v879_v24  ;;  %v138_v13 = vld [vmem:[#allocation6 + $0x1c8] sm:$0xff]  ;;  %v140_v14 = vld [vmem:[#allocation6 + $0x1d8] sm:$0xff]  ;;  %v77_v16 = vld [vmem:[#allocation3 + $0x40] sm:$0xff]  ;;  %v901_v20 = vpack.c.bf16 %v135_v11, %v133_v10 }
  0x5a   :  { %v970_v17 = vld [vmem:[#allocation8 + $0x10] sm:$0xff]   ;;  %v137_v18 = vld [vmem:[#allocation6 + $0x1c0] sm:$0xff]  ;;  %v903_v21 = vpack.c.bf16 %v140_v14, %v138_v13  ;;  %v142_v22 = vld [vmem:[#allocation6 + $0x1e8] sm:$0xff] }
  0x5b   :  { %938 = vmatpush1.bf16.msra.mxu1 %v937_v45  ;;  %v139_v19 = vld [vmem:[#allocation6 + $0x1d0] sm:$0xff]  ;;  %v144_v23 = vld [vmem:[#allocation6 + $0x1f8] sm:$0xff]  ;;  %v141_v27 = vld [vmem:[#allocation6 + $0x1e0] sm:$0xff] }
  0x5c   :  { %882 = vmatpush1.bf16.msra.mxu0 %v881_v32  ;;  %940 = vmatprep.subr.bf16.mxu1 %v939_v48  ;;  %v80_v24 = vld [vmem:[#allocation3 + $0x58] sm:$0xff]  ;;  %v905_v25 = vpack.c.bf16 %v139_v19, %v137_v18  ;;  %v907_v26 = vpack.c.bf16 %v144_v23, %v142_v22  ;;  %v143_v28 = vld [vmem:[#allocation6 + $0x1f0] sm:$0xff]  ;;  %v69_v30 = vld [vmem:[#allocation3] sm:$0xff] }
  0x5d   :  { %884 = vmatprep.subr.bf16.mxu0 %v883_v37  ;;  %v909_v29 = vpack.c.bf16 %v143_v28, %v141_v27  ;;  %v1184_v31 = vld [vmem:[#allocation3 + $0x20] sm:$0xff]  ;;  %v1187_v32 = vld [vmem:[#allocation3 + $0x38] sm:$0xff]  ;;  %v75_v33 = vld [vmem:[#allocation3 + $0x30] sm:$0xff] }
  0x5e   :  { %v1190_v34 = vld [vmem:[#allocation3 + $0x50] sm:$0xff]  ;;  %v78_v35 = vld [vmem:[#allocation3 + $0x48] sm:$0xff]  ;;  %v971_v37 = vld [vmem:[#allocation8 + $0x58] sm:$0xff]  }
  0x5f   :  { %942 = vmatpush1.bf16.msra.mxu1 %v941_v55  ;;  %v972_v38 = vld [vmem:[#allocation8 + $0x18] sm:$0xff]   ;;  %v973_v39 = vld [vmem:[#allocation8 + $0x60] sm:$0xff]   ;;  %v975_v41 = vld [vmem:[#allocation8 + $0x68] sm:$0xff]  }
  0x60   :  { %886 = vmatpush1.bf16.msra.mxu0 %v885_v47  ;;  %789 = vmatprep.subr.bf16.mxu1 %v965_v59  ;;  %v974_v40 = vld [vmem:[#allocation8 + $0x20] sm:$0xff]   ;;  %v976_v42 = vld [vmem:[#allocation8 + $0x28] sm:$0xff]   ;;  %v977_v43 = vld [vmem:[#allocation8 + $0x70] sm:$0xff]  }
  0x61   :  { %888 = vmatprep.subr.bf16.mxu0 %v887_v50  ;;  %v978_v44 = vld [vmem:[#allocation8 + $0x30] sm:$0xff]   ;;  %v979_v45 = vld [vmem:[#allocation8 + $0x78] sm:$0xff]   ;;  %v981_v47 = vld [vmem:[#allocation8 + $0x80] sm:$0xff]  }
  0x62   :  { %331 = vmatmul.mubr.f32.vlgmr.msra.gmra.mrb[0].mxu1 %v71_v61  ;;  %v980_v46 = vld [vmem:[#allocation8 + $0x38] sm:$0xff]   ;;  %v982_v23 = vld [vmem:[#allocation8 + $0x88] sm:$0xff]  }
  0x63   :  { %336 = vmatprep.mubr.f32.mxu1 %v1092_v0  ;;  %790 = vmatpush3.bf16.msra.mxu1 %v966_v62  ;;  %v761_v57 = vld [vmem:[%s1235_s2] ss:$0 sm:$0xff] }
  0x64   :  { %890 = vmatpush1.bf16.msra.mxu0 %v889_v56  ;;  %791 = vmatprep.subr.bf16.mxu1 %v967_v63 }
  0x65   :  { %892 = vmatprep.subr.bf16.mxu0 %v891_v60 }
  0x66   :  { %337 = vmatmul.mubr.f32.gmra.mrb[2].mxu1 %v74_v7 }
  0x67   :  { %342 = vmatprep.mubr.f32.mxu1 %v1092_v0  ;;  %792 = vmatpush3.bf16.msra.mxu1 %v968_v8 }
  0x68   :  { %894 = vmatpush1.bf16.msra.mxu0 %v893_v3  ;;  %793 = vmatprep.subr.bf16.mxu1 %v969_v9 }
  0x69   :  { %896 = vmatprep.subr.bf16.mxu0 %v895_v6 }
  0x6a   :  { %343 = vmatmul.mubr.f32.gmra.mrb[4].mxu1 %v77_v16 }
  0x6b   :  { %348 = vmatprep.mubr.f32.mxu1 %v1092_v0  ;;  %794 = vmatpush3.bf16.msra.mxu1 %v970_v17  ;;  %v72_v0 = vld [vmem:[#allocation3 + $0x18] sm:$0xff] }
  0x6c   :  { %898 = vmatpush1.bf16.msra.mxu0 %v897_v12  ;;  %795 = vmatprep.subr.bf16.mxu1 %v971_v37  ;;  %v986_v37 = vld [vmem:[#allocation8 + $0xa8] sm:$0xff]  }
  0x6d   :  { %900 = vmatprep.subr.bf16.mxu0 %v899_v15 }
  0x6e   :  { %349 = vmatmul.mubr.f32.gmra.mrb[6].mxu1 %v80_v24 }
  0x6f   :  { %796 = vmatpush3.bf16.msra.mxu1 %v972_v38  ;;  %v987_v38 = vld [vmem:[#allocation8 + $0xb0] sm:$0xff]  }
  0x70   :  { %902 = vmatpush1.bf16.msra.mxu0 %v901_v20  ;;  %797 = vmatprep.subr.bf16.mxu1 %v973_v39  ;;  %v988_v39 = vld [vmem:[#allocation8 + $0xb8] sm:$0xff]  }
  0x71   :  { %904 = vmatprep.subr.bf16.mxu0 %v903_v21 }
  0x73   :  { %798 = vmatpush3.bf16.msra.mxu1 %v974_v40 }
  0x74   :  { %906 = vmatpush1.bf16.msra.mxu0 %v905_v25  ;;  %799 = vmatprep.subr.bf16.mxu1 %v975_v41  ;;  %v983_v25 = vld [vmem:[#allocation8 + $0x90] sm:$0xff]  }
  0x75   :  { %908 = vmatprep.subr.bf16.mxu0 %v907_v26 }
  0x77   :  { %800 = vmatpush3.bf16.msra.mxu1 %v976_v42 }
  0x78   :  { %910 = vmatpush1.bf16.msra.mxu0 %v909_v29  ;;  %801 = vmatprep.subr.bf16.mxu1 %v977_v43 }
  0x7b   :  { %242 = vmatmul.mubr.f32.vlgmr.msra.gmra.mrb[0].mxu0 %v69_v30  ;;  %802 = vmatpush3.bf16.msra.mxu1 %v978_v44 }
  0x7c   :  { %247 = vmatprep.mubr.f32.mxu0 %v1184_v31  ;;  %803 = vmatprep.subr.bf16.mxu1 %v979_v45 }
  0x7f   :  { %248 = vmatmul.mubr.f32.gmra.mrb[2].mxu0 %v72_v0  ;;  %804 = vmatpush3.bf16.msra.mxu1 %v980_v46  ;;  %v984_v0 = vld [vmem:[#allocation8 + $0x98] sm:$0xff]  }
  0x80   :  { %253 = vmatprep.mubr.f32.mxu0 %v1187_v32  ;;  %827 = vmatprep.subr.bf16.mxu1 %v981_v47 }
  0x83   :  { %254 = vmatmul.mubr.f32.gmra.mrb[4].mxu0 %v75_v33 }
  0x84   :  { %259 = vmatprep.mubr.f32.mxu0 %v1190_v34 }
  0x87   :  { %260 = vmatmul.mubr.f32.gmra.mrb[6].mxu0 %v78_v35  ;;  %v985_v35 = vld [vmem:[#allocation8 + $0xa0] sm:$0xff]  }
 0x135   :  { %v332_v48 = vpop.f32.mrb[0].mxu1 }
 0x136   :  { %v334_v49 = vpop.f32.mrb[1].mxu1 }
 0x139   :  { %v338_v50 = vpop.f32.mrb[2].mxu1 }
 0x13a   :  { %v340_v51 = vpop.f32.mrb[3].mxu1 }
 0x13d   :  { %v344_v52 = vpop.f32.mrb[4].mxu1 }
 0x13e   :  { %v346_v53 = vpop.f32.mrb[5].mxu1 }
 0x141   :  { %v350_v54 = vpop.f32.mrb[6].mxu1 }
 0x142   :  { %v352_v55 = vpop.f32.mrb[7].mxu1 }
 0x14e   :  { %v243_v56 = vpop.f32.mrb[0].mxu0 }
 0x14f   :  { %v333_v58 = vadd.f32 %v332_v48, %v243_v56  ;;  %v245_v59 = vpop.f32.mrb[1].mxu0  ;;  %v786_v56 = vld [vmem:[%s1237_s4] ss:$0 sm:$0xff]  ;;  %s1094_s4 = smov [#allocation9]  }
 0x150   :  { %v1196_v60 = vadd.f32 %v334_v49, %v245_v59  ;;  %v787_v59 = vld [vmem:[%s1238_s5] ss:$0 sm:$0xff]  ;;  %s748_s5 = sshll.u32 %s1094_s4, 4  ;;  %s749_s5 = int_to_ptr.vmem [resolvable:$true] %s748_s5 }
 0x151   :  { %v362_v61 = vadd.f32 %v761_v57, %v333_v58  ;;  %p1060_p11 = scmp.lt.s32.totalorder %s749_s5, %s749_s5 }
 0x152   :  { %v249_v62 = vpop.f32.mrb[2].mxu0 }
 0x153   :  { %vm366_vm0 = vcmp.gt.f32.partialorder %v362_v61, 0.0  ;;  %v339_v63 = vadd.f32 %v338_v50, %v249_v62  ;;  %v251_v1 = vpop.f32.mrb[3].mxu0 }
 0x154   :  { %v370_v3 = vsel %vm366_vm0, 1.0, %v1093_v2  ;;  %v1198_v4 = vadd.f32 %v340_v51, %v251_v1 }
 0x155   :  { %375 = vst [vmem:[#allocation2 + $0x1] sm:$0xff] %v370_v3  ;;  %v363_v5 = vadd.f32 %v761_v57, %v339_v63 }
 0x156   :  { %v255_v6 = vpop.f32.mrb[4].mxu0 }
 0x157   :  { %vm367_vm1 = vcmp.gt.f32.partialorder %v363_v5, 0.0  ;;  %v345_v7 = vadd.f32 %v344_v52, %v255_v6  ;;  %v257_v8 = vpop.f32.mrb[5].mxu0 }
 0x158   :  { %v371_v9 = vsel %vm367_vm1, 1.0, %v1093_v2  ;;  %v1200_v10 = vadd.f32 %v346_v53, %v257_v8  ;;  %v788_v8 = vld [vmem:[%s1239_s6] ss:$0 sm:$0xff]  ;;  %s1055_s6 = scalar_lea.vmem %s749_s5, 512 }
 0x159   :  { %376 = vst [vmem:[#allocation2 + $0x9] sm:$0xff] %v371_v9  ;;  %v364_v11 = vadd.f32 %v761_v57, %v345_v7  ;;  %v395_v12 = vpack.c.bf16 %v371_v9, %v370_v3  ;;  %p1056_p10 = scmp.ne.s32.totalorder %s749_s5, %s1055_s6  ;;  %p1061_p12 = scmp.lt.s32.totalorder %s1055_s6, %s1055_s6 }
 0x15a   :  { %v261_v13 = vpop.f32.mrb[6].mxu0 }
 0x15b   :  { %vm368_vm2 = vcmp.gt.f32.partialorder %v364_v11, 0.0  ;;  %v351_v14 = vadd.f32 %v350_v54, %v261_v13  ;;  %624 = vmatprep.mubr.bf16.mxu1 %v395_v12  ;;  %v263_v15 = vpop.f32.mrb[7].mxu0  ;;  %p1062_p13 = por %p1061_p12, %p1060_p11 }
 0x15c   :  { %v372_v16 = vsel %vm368_vm2, 1.0, %v1093_v2  ;;  %v1202_v17 = vadd.f32 %v352_v55, %v263_v15  ;;  %v382_v20 = vld [vmem:[#allocation2] sm:$0xff] }
 0x15d   :  { %379 = vst [vmem:[#allocation2 + $0x13] sm:$0xff] %v372_v16  ;;  %v365_v18 = vadd.f32 %v761_v57, %v351_v14  ;;  %p1063_p0 = pnand %p1062_p13, %p1056_p10 }
 0x15f   :  { %vm369_vm3 = vcmp.gt.f32.partialorder %v365_v18, 0.0 }
 0x160   :  { %v373_v19 = vsel %vm369_vm3, 1.0, %v1093_v2  ;;  %v383_v21 = vld [vmem:[#allocation2 + $0x8] sm:$0xff] }
 0x161   :  { %380 = vst [vmem:[#allocation2 + $0x1b] sm:$0xff] %v373_v19  ;;  %v394_v22 = vpack.c.bf16 %v383_v21, %v382_v20  ;;  %v398_v24 = vpack.c.bf16 %v373_v19, %v372_v16  ;;  %v390_v27 = vld [vmem:[#allocation2 + $0x2] sm:$0xff]  ;;  %v391_v28 = vld [vmem:[#allocation2 + $0xa] sm:$0xff] }
 0x162   :  { %v396_v33 = vpack.c.bf16 %v391_v28, %v390_v27 }
 0x163   :  { %625 = vmatmul.mubr.bf16.vlgmr.msra.gmra.mrb[8].mxu1 %v394_v22 }
 0x164   :  { %828 = vmatpush3.bf16.msra.mxu1 %v981_v47  ;;  %632 = vmatprep.mubr.bf16.mxu1 %v398_v24  ;;  %v384_v26 = vld [vmem:[#allocation2 + $0x12] sm:$0xff] }
 0x165   :  { %829 = vmatprep.subr.bf16.mxu1 %v982_v23 }
 0x168   :  { %830 = vmatpush3.bf16.msra.mxu1 %v982_v23  ;;  %v385_v29 = vld [vmem:[#allocation2 + $0x1a] sm:$0xff] }
 0x169   :  { %831 = vmatprep.subr.bf16.mxu1 %v983_v25  ;;  %v397_v30 = vpack.c.bf16 %v385_v29, %v384_v26  ;;  %v392_v40 = vld [vmem:[#allocation2 + $0x14] sm:$0xff]  ;;  %v393_v41 = vld [vmem:[#allocation2 + $0x1c] sm:$0xff] }
 0x16a   :  { %v399_v42 = vpack.c.bf16 %v393_v41, %v392_v40 }
 0x16b   :  { %633 = vmatmul.mubr.bf16.gmra.mrb[12].mxu1 %v397_v30 }
 0x16c   :  { %832 = vmatpush3.bf16.msra.mxu1 %v983_v25  ;;  %843 = vmatprep.mubr.bf16.mxu1 %v396_v33 }
 0x16d   :  { %833 = vmatprep.subr.bf16.mxu1 %v984_v0 }
 0x170   :  { %834 = vmatpush3.bf16.msra.mxu1 %v984_v0 }
 0x171   :  { %835 = vmatprep.subr.bf16.mxu1 %v985_v35 }
 0x174   :  { %836 = vmatpush3.bf16.msra.mxu1 %v985_v35 }
 0x175   :  { %837 = vmatprep.subr.bf16.mxu1 %v986_v37 }
 0x178   :  { %838 = vmatpush3.bf16.msra.mxu1 %v986_v37 }
 0x179   :  { %839 = vmatprep.subr.bf16.mxu1 %v987_v38 }
 0x17c   :  { %840 = vmatpush3.bf16.msra.mxu1 %v987_v38 }
 0x17d   :  { %841 = vmatprep.subr.bf16.mxu1 %v988_v39 }
 0x180   :  { %842 = vmatpush3.bf16.msra.mxu1 %v988_v39 }
 0x183   :  { %844 = vmatmul.mubr.bf16.vlgmr.msra.gmra.mrb[16].mxu1 %v399_v42 }
 0x236   :  { %v805_v43 = vpop.f32.mrb[8].mxu1 }
 0x237   :  { %v806_v44 = vpop.f32.mrb[9].mxu1 }
 0x238   :  { %v807_v45 = vadd.f32 %v806_v44, %v805_v43  ;;  %v808_v46 = vpop.f32.mrb[10].mxu1 }
 0x239   :  { %v809_v47 = vpop.f32.mrb[11].mxu1 }
 0x23a   :  { %v810_v48 = vadd.f32 %v809_v47, %v808_v46 }
 0x23e   :  { %v811_v49 = vpop.f32.mrb[12].mxu1 }
 0x23f   :  { %v812_v50 = vpop.f32.mrb[13].mxu1 }
 0x240   :  { %v813_v51 = vadd.f32 %v812_v50, %v811_v49  ;;  %v814_v52 = vpop.f32.mrb[14].mxu1 }
 0x241   :  { %v815_v53 = vpop.f32.mrb[15].mxu1 }
 0x242   :  { %v816_v54 = vadd.f32 %v815_v53, %v814_v52 }
 0x256   :  { %v845_v55 = vpop.f32.mrb[16].mxu1 }
 0x257   :  { %v684_v57 = vadd.f32 %v845_v55, %v813_v51  ;;  %v675_v58 = vpop.f32.mrb[17].mxu1 }
 0x258   :  { %v676_v61 = vadd.f32 %v807_v45, %v675_v58  ;;  %v846_v62 = vpop.f32.mrb[18].mxu1 }
 0x259   :  { %v699_v63 = vmul.f32 %v786_v56, %v684_v57  ;;  %v687_v1 = vadd.f32 %v846_v62, %v816_v54  ;;  %v678_v2 = vpop.f32.mrb[19].mxu1 }
 0x25a   :  { %v697_v3 = vmul.f32 %v786_v56, %v676_v61  ;;  %v679_v5 = vadd.f32 %v810_v48, %v678_v2 }
 0x25b   :  { %v710_v6 = vadd.f32 %v787_v59, %v699_v63  ;;  %v700_v7 = vmul.f32 %v786_v56, %v687_v1 }
 0x25c   :  { %v708_v9 = vadd.f32 %v787_v59, %v697_v3  ;;  %v698_v11 = vmul.f32 %v786_v56, %v679_v5 }
 0x25d   :  { %v714_v12 = vadd.f32 %v710_v6, %v1200_v10  ;;  %v711_v13 = vadd.f32 %v787_v59, %v700_v7 }
 0x25e   :  { %v712_v14 = vadd.f32 %v708_v9, %v1196_v60  ;;  %v709_v15 = vadd.f32 %v787_v59, %v698_v11 }
 0x25f   :  { %vm718_vm4 = vcmp.ge.f32.partialorder %v714_v12, 0.0  ;;  %v729_v16 = vmul.f32 %v788_v8, %v714_v12  ;;  %v715_v18 = vadd.f32 %v711_v13, %v1202_v17 }
 0x260   :  { %vm716_vm5 = vcmp.ge.f32.partialorder %v712_v14, 0.0  ;;  %v727_v19 = vmul.f32 %v788_v8, %v712_v14  ;;  %v713_v20 = vadd.f32 %v709_v15, %v1198_v4 }
 0x261   :  { %v733_v21 = vsel %vm718_vm4, %v714_v12, %v729_v16  ;;  %vm719_vm6 = vcmp.ge.f32.partialorder %v715_v18, 0.0  ;;  %v730_v22 = vmul.f32 %v788_v8, %v715_v18 }
 0x262   :  { %v737_v23 = vadd.f32 %v733_v21, %v1187_v32  ;;  %v731_v10 = vsel %vm716_vm5, %v712_v14, %v727_v19  ;;  %vm717_vm7 = vcmp.ge.f32.partialorder %v713_v20, 0.0  ;;  %v728_v24 = vmul.f32 %v788_v8, %v713_v20 }
 0x263   :  { %v735_v60 = vadd.f32 %v731_v10, %v1178_v36  ;;  %v734_v25 = vsel %vm719_vm6, %v715_v18, %v730_v22 }
 0x264   :  { %741 = vst [vmem:[#allocation9 + $0x10] sm:$0xff] %v737_v23  ;;  %v738_v17 = vadd.f32 %v734_v25, %v1190_v34  ;;  %v732_v26 = vsel %vm717_vm7, %v713_v20, %v728_v24 }
 0x265   :  { %739 = vst [vmem:[#allocation9] sm:$0xff] %v735_v60  ;;  %v736_v4 = vadd.f32 %v732_v26, %v1184_v31 }
 0x266   :  { %742 = vst [vmem:[#allocation9 + $0x18] sm:$0xff] %v738_v17 }
 0x267   :  { %740 = vst [vmem:[#allocation9 + $0x8] sm:$0xff] %v736_v4 }
 0x268   :  { %1066 = shalt.err (!%p1063_p0)
}
 0x269   :  { %s1067_s25 = scalar_lea.hbm %s1240_s7, 512 }
 0x26a   :  { %p1068_p1 = scmp.ne.s32.totalorder %s1240_s7, %s1067_s25  ;;  %p1071_p2 = scmp.lt.u32.totalorder %s1067_s25, %s1240_s7 }
 0x26c   :  { %p1073_p3 = pnand %p1071_p2, %p1068_p1 }
 0x26e   :  { %1076 = shalt.err (!%p1073_p3)
}
 0x26f   :  { %s1095_s30 = smov 128   ;;  %s1096_s8 = smov 8  }
 0x270   :  { %754 = dma.vmem_to_hbm [thread:$0]  %s749_s5, 512, %s1240_s7, [#allocation5], %s1095_s30, %s1095_s30, %s1096_s8  }
 0x271   :  { %1081 = dma.done.wait [#allocation5], 512  }
 0x272   :  { %1082 = vsyncadd [#allocation5], 4294966784 }
 0x273   :  { %758 = vsyncpa [#allocation4], 1 }
 0x274   :  { %759 = vsyncpa [#allocation7], 1 }
 0x275   :  { %760 = vsyncpa [#allocation5], 1 }

</bundles_post_ra>
